<compile_context>
chip_gen: v7x
topology: tpu7x:2x2x1
jax: 0.10.0
libtpu: 0.0.40
codegen_flags: <defaults>
</compile_context>

<pallas_src>
import jax
import jax.numpy as jnp
from jax.experimental import pallas as pl
from jax.experimental.pallas import tpu as pltpu


def _round_up(v, m):
    return ((v + m - 1) // m) * m


def _pad2(a, rows, cols):
    out = jnp.zeros((rows, cols), jnp.float32)
    return out.at[: a.shape[0], : a.shape[1]].set(a.astype(jnp.float32))


def _conv_tail(neigh, xr, wr, bias, out_ref, apply_relu):
    """bias + root-term matmul, L2 row-normalize (rsqrt), optional ReLU, store."""
    h = neigh + bias + jnp.dot(xr, wr, preferred_element_type=jnp.float32)
    ss = jnp.sum(h * h, axis=-1, keepdims=True)
    h = h * jax.lax.rsqrt(jnp.maximum(ss, 1e-24))   # == h / max(||h||_2, 1e-12)
    if apply_relu:
        h = jnp.maximum(h, 0.0)
    out_ref[...] = h.astype(out_ref.dtype)


def _make_conv_kernel(project_after_agg, apply_relu):
    if project_after_agg:
        # neigh = ((A01 @ X) * 1/deg) @ W_l   (aggregate the raw features first)
        def kernel(a_ref, invd_ref, xn_ref, xr_ref, wl_ref, bl_ref, wr_ref, out_ref):
            agg = jnp.dot(a_ref[...], xn_ref[...],
                          preferred_element_type=jnp.float32)
            agg = agg * invd_ref[...]                        # mean aggregation (f32)
            neigh = jnp.dot(agg.astype(jnp.bfloat16), wl_ref[...],
                            preferred_element_type=jnp.float32)
            _conv_tail(neigh, xr_ref[...], wr_ref[...], bl_ref[...],
                       out_ref, apply_relu)
    else:
        # xn already holds X @ W_l (projected first): neigh = (A01 @ xn) * 1/deg
        def kernel(a_ref, invd_ref, xn_ref, xr_ref, bl_ref, wr_ref, out_ref):
            agg = jnp.dot(a_ref[...], xn_ref[...],
                          preferred_element_type=jnp.float32)
            neigh = agg * invd_ref[...]
            _conv_tail(neigh, xr_ref[...], wr_ref[...], bl_ref[...],
                       out_ref, apply_relu)
    return kernel


def _proj_kernel(x_ref, w_ref, o_ref):
    o_ref[...] = jnp.dot(x_ref[...], w_ref[...],
                         preferred_element_type=jnp.float32).astype(o_ref.dtype)


def _row_tiled_matmul(x, w, tile):
    """X @ W as a row-tiled Pallas matmul (used only when projecting first)."""
    n_pad, f_in = x.shape
    h = w.shape[1]
    return pl.pallas_call(
        _proj_kernel,
        out_shape=jax.ShapeDtypeStruct((n_pad, h), jnp.bfloat16),
        grid=(n_pad // tile,),
        in_specs=[pl.BlockSpec((tile, f_in), lambda i: (i, 0)),
                  pl.BlockSpec((f_in, h), lambda i: (0, 0))],
        out_specs=pl.BlockSpec((tile, h), lambda i: (i, 0)),
        compiler_params=pltpu.CompilerParams(
            dimension_semantics=("parallel",)),
    )(x, w)


def _sage_conv(a01, inv_deg, x_agg, x_root, wl, bl, wr, *,
               tile, apply_relu, project_after_agg):
    n_pad = a01.shape[0]
    k = x_agg.shape[1]
    f_in = x_root.shape[1]
    h = wr.shape[1]
    grid = (n_pad // tile,)

    in_specs = [
        pl.BlockSpec((tile, n_pad), lambda i: (i, 0)),   # 0/1 adjacency row tile (bf16)
        pl.BlockSpec((tile, 1), lambda i: (i, 0)),       # 1/deg row tile (f32)
        pl.BlockSpec((n_pad, k), lambda i: (0, 0)),      # aggregation-side features (resident)
        pl.BlockSpec((tile, f_in), lambda i: (i, 0)),    # root-side features row tile
    ]
    args = [a01, inv_deg, x_agg, x_root]
    if project_after_agg:
        in_specs.append(pl.BlockSpec(wl.shape, lambda i: (0, 0)))   # lin_l weight
        args.append(wl)
    in_specs += [
        pl.BlockSpec((1, h), lambda i: (0, 0)),          # lin_l bias
        pl.BlockSpec(wr.shape, lambda i: (0, 0)),        # lin_r weight
    ]
    args += [bl, wr]

    # Advisory cost estimate so XLA can schedule surrounding glue around the kernel.
    flops = 2.0 * n_pad * n_pad * k + 2.0 * n_pad * f_in * h
    if project_after_agg:
        flops += 2.0 * n_pad * k * h
    bytes_accessed = (a01.size * 2 + inv_deg.size * 4 + x_agg.size * 2
                      + x_root.size * 2 + wr.size * 2 + bl.size * 4
                      + (wl.size * 2 if project_after_agg else 0)
                      + n_pad * h * 4)

    # VMEM budget: double-buffered row tiles + resident full blocks, with headroom,
    # clamped so it stays safe on v7x's smaller (64 MiB physical) VMEM.
    per_tile = tile * n_pad * 2 + tile * 4 + tile * f_in * 2 + tile * h * 4
    resident = n_pad * k * 2 + 2 * f_in * h * 2 + h * 4
    vmem_limit = int(min(max(4 * per_tile + 2 * resident, 16 * 1024 * 1024),
                         48 * 1024 * 1024))

    return pl.pallas_call(
        _make_conv_kernel(project_after_agg, apply_relu),
        out_shape=jax.ShapeDtypeStruct((n_pad, h), jnp.float32),
        grid=grid,
        in_specs=in_specs,
        out_specs=pl.BlockSpec((tile, h), lambda i: (i, 0)),
        compiler_params=pltpu.CompilerParams(
            dimension_semantics=("parallel",),     # row tiles shard across TCs on v7x
            vmem_limit_bytes=vmem_limit),
        cost_estimate=pl.CostEstimate(flops=int(flops),
                                      transcendentals=int(n_pad),
                                      bytes_accessed=int(bytes_accessed)),
    )(*args)


def sage_forward(x, edge_index, params, *, tile_n=256):
    n, nfeat = x.shape
    nhid = params["w1l"].shape[1]

    # Lane-dense feature padding (multiples of 128) + row padding to the tile size.
    f_pad = _round_up(nfeat, 128)
    h_pad = _round_up(nhid, 128)
    n16 = _round_up(n, 16)
    if n16 <= tile_n:
        tile, n_pad = n16, n16
    else:
        tile, n_pad = tile_n, _round_up(n16, tile_n)

    # Dense 0/1 adjacency (exact in bf16) + f32 inverse in-degree for the mean.
    # TODO(synk): for large graphs replace with an edge-list gather aggregation
    # (PrefetchScalarGridSpec: per-node neighbour offsets/indices in SMEM + row
    # gather) to avoid the O(N^2) dense adjacency; dense A is the small-N fallback.
    src, dst = edge_index[0], edge_index[1]
    a01 = jnp.zeros((n_pad, n_pad), jnp.float32).at[dst, src].add(1.0)
    deg = jnp.sum(a01, axis=1, keepdims=True)
    inv_deg = 1.0 / jnp.maximum(deg, 1.0)            # isolated targets aggregate to 0
    a01 = a01.astype(jnp.bfloat16)

    x_bf = _pad2(x, n_pad, f_pad).astype(jnp.bfloat16)

    w1l = _pad2(params["w1l"], f_pad, h_pad).astype(jnp.bfloat16)
    w1r = _pad2(params["w1r"], f_pad, h_pad).astype(jnp.bfloat16)
    b1l = _pad2(params["b1l"], 1, h_pad)
    w2l = _pad2(params["w2l"], h_pad, h_pad).astype(jnp.bfloat16)
    w2r = _pad2(params["w2r"], h_pad, h_pad).astype(jnp.bfloat16)
    b2l = _pad2(params["b2l"], 1, h_pad)
    gamma = _pad2(params["gamma"], 1, h_pad)
    beta = _pad2(params["beta"], 1, h_pad)

    # ---- conv1: SAGEConv(nfeat, nhid, aggr='mean', normalize=True) + fused ReLU ----
    # Static associativity: aggregate raw features when F_in <= F_out, otherwise
    # project first so the O(N^2) aggregation matmul runs over the smaller width.
    proj_after_1 = f_pad <= h_pad
    xn1 = x_bf if proj_after_1 else _row_tiled_matmul(x_bf, w1l, tile)
    h1 = _sage_conv(a01, inv_deg, xn1, x_bf, w1l, b1l, w1r,
                    tile=tile, apply_relu=True, project_after_agg=proj_after_1)

    # ---- transition tail: BatchNorm1d over real rows (train-mode batch stats). ----
    # Cross-row reduction -> cheap JAX glue between the two row-tiled conv kernels.
    h1r = h1[:n]
    mu = jnp.mean(h1r, axis=0, keepdims=True)
    var = jnp.maximum(jnp.mean(h1r * h1r, axis=0, keepdims=True) - mu * mu, 0.0)
    h_bn = (h1 - mu) * jax.lax.rsqrt(var + 1e-5) * gamma + beta
    # TODO(synk): Dropout(p=0.5) left as identity (deterministic / eval behaviour).
    h_bn_bf = h_bn.astype(jnp.bfloat16)

    # ---- conv2: SAGEConv(nhid, nhid, aggr='mean', normalize=True) ----
    h2 = _sage_conv(a01, inv_deg, h_bn_bf, h_bn_bf, w2l, b2l, w2r,
                    tile=tile, apply_relu=False, project_after_agg=True)

    return h2[:n, :nhid]


def xavier_uniform(key, fan_in, fan_out):
    bound = (6.0 / (fan_in + fan_out)) ** 0.5
    return jax.random.uniform(key, (fan_in, fan_out), jnp.float32, -bound, bound)


def init_params(key, nfeat, nhid):
    k1, k2, k3, k4 = jax.random.split(key, 4)
    return {
        # conv1: lin_l (aggregated neighbors, with bias), lin_r (root, no bias)
        "w1l": xavier_uniform(k1, nfeat, nhid),
        "b1l": jnp.zeros((1, nhid), jnp.float32),
        "w1r": xavier_uniform(k2, nfeat, nhid),
        # BatchNorm1d(nhid) affine params
        "gamma": jnp.ones((1, nhid), jnp.float32),
        "beta": jnp.zeros((1, nhid), jnp.float32),
        # conv2
        "w2l": xavier_uniform(k3, nhid, nhid),
        "b2l": jnp.zeros((1, nhid), jnp.float32),
        "w2r": xavier_uniform(k4, nhid, nhid),
    }


if __name__ == "__main__":
    N, NFEAT, NHID = 16, 8, 32

    key = jax.random.PRNGKey(0)
    kx, kp = jax.random.split(key)

    x = jax.random.normal(kx, (N, NFEAT), jnp.float32)

    # Deterministic graph: bidirectional ring over N nodes (E = 2N edges).
    idx = jnp.arange(N, dtype=jnp.int32)
    src = jnp.concatenate([idx, (idx + 1) % N])
    dst = jnp.concatenate([(idx + 1) % N, idx])
    edge_index = jnp.stack([src, dst])          # [2, 2N], row0=source, row1=target

    params = init_params(kp, NFEAT, NHID)

    fwd = jax.jit(sage_forward)
    out = fwd(x, edge_index, params)
    out = jax.block_until_ready(out)

    assert out.shape == (N, NHID)
    assert bool(jnp.all(jnp.isfinite(out)))
    print("KERNEL_OK")
</pallas_src>

<mosaic_0001>
module attributes {stable_mosaic.version = 11 : i64} {
  func.func private @main(%arg0: i32) attributes {dimension_semantics = [#tpu.dimension_semantics<core_parallel>], iteration_bounds = array<i64: 2>, tpu.core_type = #tpu.core_type<sc_scalar_subcore>, window_params = []} {
    return
  }
}

module attributes {stable_mosaic.version = 11 : i64} {
  func.func private @main(%arg0: i32) attributes {dimension_semantics = [#tpu.dimension_semantics<core_parallel>], iteration_bounds = array<i64: 2>, tpu.core_type = #tpu.core_type<sc_scalar_subcore>, window_params = []} {
    return
  }
}

module attributes {stable_mosaic.version = 11 : i64} {
  func.func @kernel(%arg0: i32, %arg1: memref<16x16xbf16, #tpu.memory_space<vmem>>, %arg2: memref<16x1xf32, #tpu.memory_space<vmem>>, %arg3: memref<16x128xbf16, #tpu.memory_space<vmem>>, %arg4: memref<16x128xbf16, #tpu.memory_space<vmem>>, %arg5: memref<128x128xbf16, #tpu.memory_space<vmem>>, %arg6: memref<1x128xf32, #tpu.memory_space<vmem>>, %arg7: memref<128x128xbf16, #tpu.memory_space<vmem>>, %arg8: memref<16x128xf32, #tpu.memory_space<vmem>>) attributes {dimension_semantics = [#tpu.dimension_semantics<parallel>], iteration_bounds = array<i64: 1>, scalar_prefetch = 0 : i64, scratch_operands = 0 : i64, tpu.core_type = #tpu.core_type<tc>, window_params = [{transform_indices = @transform_0, window_bounds = array<i64: 16, 16>}, {transform_indices = @transform_1, window_bounds = array<i64: 16, 1>}, {pipeline_mode = #tpu.pipeline_mode<synchronous>, transform_indices = @transform_2, window_bounds = array<i64: 16, 128>}, {transform_indices = @transform_3, window_bounds = array<i64: 16, 128>}, {pipeline_mode = #tpu.pipeline_mode<synchronous>, transform_indices = @transform_4, window_bounds = array<i64: 128, 128>}, {pipeline_mode = #tpu.pipeline_mode<synchronous>, transform_indices = @transform_5, window_bounds = array<i64: 1, 128>}, {pipeline_mode = #tpu.pipeline_mode<synchronous>, transform_indices = @transform_6, window_bounds = array<i64: 128, 128>}, {transform_indices = @transform_7, window_bounds = array<i64: 16, 128>}]} {
    %c0 = arith.constant 0 : index
    %c0_0 = arith.constant 0 : index
    %0 = vector.load %arg1[%c0, %c0_0] : memref<16x16xbf16, #tpu.memory_space<vmem>>, vector<16x16xbf16>
    %c0_1 = arith.constant 0 : index
    %c0_2 = arith.constant 0 : index
    %1 = vector.load %arg3[%c0_1, %c0_2] : memref<16x128xbf16, #tpu.memory_space<vmem>>, vector<16x128xbf16>
    %cst = arith.constant dense<0.000000e+00> : vector<16x128xf32>
    %2 = tpu.matmul %0, %1, %cst {dimension_numbers = #tpu.dot_dimension_numbers<[1], [0], [0], [1], [0, 0, 1, 1], [], []>} : vector<16x16xbf16>, vector<16x128xbf16>, vector<16x128xf32> -> vector<16x128xf32>
    %c0_3 = arith.constant 0 : index
    %c0_4 = arith.constant 0 : index
    %3 = vector.load %arg2[%c0_3, %c0_4] : memref<16x1xf32, #tpu.memory_space<vmem>>, vector<16x1xf32>
    %4 = vector.broadcast %3 : vector<16x1xf32> to vector<16x128xf32>
    %5 = arith.mulf %2, %4 : vector<16x128xf32>
    %6 = arith.truncf %5 : vector<16x128xf32> to vector<16x128xbf16>
    %c0_5 = arith.constant 0 : index
    %c0_6 = arith.constant 0 : index
    %7 = vector.load %arg5[%c0_5, %c0_6] : memref<128x128xbf16, #tpu.memory_space<vmem>>, vector<128x128xbf16>
    %cst_7 = arith.constant dense<0.000000e+00> : vector<16x128xf32>
    %8 = tpu.matmul %6, %7, %cst_7 {dimension_numbers = #tpu.dot_dimension_numbers<[1], [0], [0], [1], [0, 0, 1, 1], [], []>} : vector<16x128xbf16>, vector<128x128xbf16>, vector<16x128xf32> -> vector<16x128xf32>
    %c0_8 = arith.constant 0 : index
    %c0_9 = arith.constant 0 : index
    %9 = vector.load %arg4[%c0_8, %c0_9] : memref<16x128xbf16, #tpu.memory_space<vmem>>, vector<16x128xbf16>
    %c0_10 = arith.constant 0 : index
    %c0_11 = arith.constant 0 : index
    %10 = vector.load %arg7[%c0_10, %c0_11] : memref<128x128xbf16, #tpu.memory_space<vmem>>, vector<128x128xbf16>
    %c0_12 = arith.constant 0 : index
    %c0_13 = arith.constant 0 : index
    %11 = vector.load %arg6[%c0_12, %c0_13] : memref<1x128xf32, #tpu.memory_space<vmem>>, vector<1x128xf32>
    %12 = vector.broadcast %11 : vector<1x128xf32> to vector<16x128xf32>
    %13 = arith.addf %8, %12 : vector<16x128xf32>
    %cst_14 = arith.constant dense<0.000000e+00> : vector<16x128xf32>
    %14 = tpu.matmul %9, %10, %cst_14 {dimension_numbers = #tpu.dot_dimension_numbers<[1], [0], [0], [1], [0, 0, 1, 1], [], []>} : vector<16x128xbf16>, vector<128x128xbf16>, vector<16x128xf32> -> vector<16x128xf32>
    %15 = arith.addf %13, %14 : vector<16x128xf32>
    %16 = arith.mulf %15, %15 : vector<16x128xf32>
    %cst_15 = arith.constant dense<0.000000e+00> : vector<16xf32>
    %17 = vector.multi_reduction <add>, %16, %cst_15 [1] : vector<16x128xf32> to vector<16xf32>
    %18 = vector.shape_cast %17 : vector<16xf32> to vector<16x1xf32>
    %cst_16 = arith.constant 1.000000e-24 : f32
    %19 = vector.broadcast %cst_16 : f32 to vector<16x1xf32>
    %20 = arith.maximumf %18, %19 : vector<16x1xf32>
    %21 = math.rsqrt %20 : vector<16x1xf32>
    %22 = vector.broadcast %21 : vector<16x1xf32> to vector<16x128xf32>
    %23 = arith.mulf %15, %22 : vector<16x128xf32>
    %cst_17 = arith.constant 0.000000e+00 : f32
    %24 = vector.broadcast %cst_17 : f32 to vector<16x128xf32>
    %25 = arith.maximumf %23, %24 : vector<16x128xf32>
    %c0_18 = arith.constant 0 : index
    %c0_19 = arith.constant 0 : index
    %26 = vector.load %arg8[%c0_18, %c0_19] : memref<16x128xf32, #tpu.memory_space<vmem>>, vector<16x128xf32>
    tpu.vector_store %arg8[%c0_18, %c0_19], %25 {strides = array<i32>} : memref<16x128xf32, #tpu.memory_space<vmem>>, vector<16x128xf32>,
    return
  }
  func.func @transform_0(%arg0: i32) -> (i32, i32) {
    %c0_i32 = arith.constant 0 : i32
    %c0_i32_0 = arith.constant 0 : i32
    return %arg0, %c0_i32 : i32, i32
  }
  func.func @transform_1(%arg0: i32) -> (i32, i32) {
    %c0_i32 = arith.constant 0 : i32
    %c0_i32_0 = arith.constant 0 : i32
    return %arg0, %c0_i32 : i32, i32
  }
  func.func @transform_2(%arg0: i32) -> (i32, i32) {
    %c0_i32 = arith.constant 0 : i32
    %c0_i32_0 = arith.constant 0 : i32
    %c0_i32_1 = arith.constant 0 : i32
    return %c0_i32, %c0_i32_0 : i32, i32
  }
  func.func @transform_3(%arg0: i32) -> (i32, i32) {
    %c0_i32 = arith.constant 0 : i32
    %c0_i32_0 = arith.constant 0 : i32
    return %arg0, %c0_i32 : i32, i32
  }
  func.func @transform_4(%arg0: i32) -> (i32, i32) {
    %c0_i32 = arith.constant 0 : i32
    %c0_i32_0 = arith.constant 0 : i32
    %c0_i32_1 = arith.constant 0 : i32
    return %c0_i32, %c0_i32_0 : i32, i32
  }
  func.func @transform_5(%arg0: i32) -> (i32, i32) {
    %c0_i32 = arith.constant 0 : i32
    %c0_i32_0 = arith.constant 0 : i32
    %c0_i32_1 = arith.constant 0 : i32
    return %c0_i32, %c0_i32_0 : i32, i32
  }
  func.func @transform_6(%arg0: i32) -> (i32, i32) {
    %c0_i32 = arith.constant 0 : i32
    %c0_i32_0 = arith.constant 0 : i32
    %c0_i32_1 = arith.constant 0 : i32
    return %c0_i32, %c0_i32_0 : i32, i32
  }
  func.func @transform_7(%arg0: i32) -> (i32, i32) {
    %c0_i32 = arith.constant 0 : i32
    %c0_i32_0 = arith.constant 0 : i32
    return %arg0, %c0_i32 : i32, i32
  }
}

module attributes {stable_mosaic.version = 11 : i64} {
  func.func @kernel(%arg0: i32, %arg1: memref<16x16xbf16, #tpu.memory_space<vmem>>, %arg2: memref<16x1xf32, #tpu.memory_space<vmem>>, %arg3: memref<16x128xbf16, #tpu.memory_space<vmem>>, %arg4: memref<16x128xbf16, #tpu.memory_space<vmem>>, %arg5: memref<128x128xbf16, #tpu.memory_space<vmem>>, %arg6: memref<1x128xf32, #tpu.memory_space<vmem>>, %arg7: memref<128x128xbf16, #tpu.memory_space<vmem>>, %arg8: memref<16x128xf32, #tpu.memory_space<vmem>>) attributes {dimension_semantics = [#tpu.dimension_semantics<parallel>], iteration_bounds = array<i64: 1>, scalar_prefetch = 0 : i64, scratch_operands = 0 : i64, tpu.core_type = #tpu.core_type<tc>, window_params = [{transform_indices = @transform_0, window_bounds = array<i64: 16, 16>}, {transform_indices = @transform_1, window_bounds = array<i64: 16, 1>}, {pipeline_mode = #tpu.pipeline_mode<synchronous>, transform_indices = @transform_2, window_bounds = array<i64: 16, 128>}, {transform_indices = @transform_3, window_bounds = array<i64: 16, 128>}, {pipeline_mode = #tpu.pipeline_mode<synchronous>, transform_indices = @transform_4, window_bounds = array<i64: 128, 128>}, {pipeline_mode = #tpu.pipeline_mode<synchronous>, transform_indices = @transform_5, window_bounds = array<i64: 1, 128>}, {pipeline_mode = #tpu.pipeline_mode<synchronous>, transform_indices = @transform_6, window_bounds = array<i64: 128, 128>}, {transform_indices = @transform_7, window_bounds = array<i64: 16, 128>}]} {
    %c0 = arith.constant 0 : index
    %c0_0 = arith.constant 0 : index
    %0 = vector.load %arg1[%c0, %c0_0] : memref<16x16xbf16, #tpu.memory_space<vmem>>, vector<16x16xbf16>
    %c0_1 = arith.constant 0 : index
    %c0_2 = arith.constant 0 : index
    %1 = vector.load %arg3[%c0_1, %c0_2] : memref<16x128xbf16, #tpu.memory_space<vmem>>, vector<16x128xbf16>
    %cst = arith.constant dense<0.000000e+00> : vector<16x128xf32>
    %2 = tpu.matmul %0, %1, %cst {dimension_numbers = #tpu.dot_dimension_numbers<[1], [0], [0], [1], [0, 0, 1, 1], [], []>} : vector<16x16xbf16>, vector<16x128xbf16>, vector<16x128xf32> -> vector<16x128xf32>
    %c0_3 = arith.constant 0 : index
    %c0_4 = arith.constant 0 : index
    %3 = vector.load %arg2[%c0_3, %c0_4] : memref<16x1xf32, #tpu.memory_space<vmem>>, vector<16x1xf32>
    %4 = vector.broadcast %3 : vector<16x1xf32> to vector<16x128xf32>
    %5 = arith.mulf %2, %4 : vector<16x128xf32>
    %6 = arith.truncf %5 : vector<16x128xf32> to vector<16x128xbf16>
    %c0_5 = arith.constant 0 : index
    %c0_6 = arith.constant 0 : index
    %7 = vector.load %arg5[%c0_5, %c0_6] : memref<128x128xbf16, #tpu.memory_space<vmem>>, vector<128x128xbf16>
    %cst_7 = arith.constant dense<0.000000e+00> : vector<16x128xf32>
    %8 = tpu.matmul %6, %7, %cst_7 {dimension_numbers = #tpu.dot_dimension_numbers<[1], [0], [0], [1], [0, 0, 1, 1], [], []>} : vector<16x128xbf16>, vector<128x128xbf16>, vector<16x128xf32> -> vector<16x128xf32>
    %c0_8 = arith.constant 0 : index
    %c0_9 = arith.constant 0 : index
    %9 = vector.load %arg4[%c0_8, %c0_9] : memref<16x128xbf16, #tpu.memory_space<vmem>>, vector<16x128xbf16>
    %c0_10 = arith.constant 0 : index
    %c0_11 = arith.constant 0 : index
    %10 = vector.load %arg7[%c0_10, %c0_11] : memref<128x128xbf16, #tpu.memory_space<vmem>>, vector<128x128xbf16>
    %c0_12 = arith.constant 0 : index
    %c0_13 = arith.constant 0 : index
    %11 = vector.load %arg6[%c0_12, %c0_13] : memref<1x128xf32, #tpu.memory_space<vmem>>, vector<1x128xf32>
    %12 = vector.broadcast %11 : vector<1x128xf32> to vector<16x128xf32>
    %13 = arith.addf %8, %12 : vector<16x128xf32>
    %cst_14 = arith.constant dense<0.000000e+00> : vector<16x128xf32>
    %14 = tpu.matmul %9, %10, %cst_14 {dimension_numbers = #tpu.dot_dimension_numbers<[1], [0], [0], [1], [0, 0, 1, 1], [], []>} : vector<16x128xbf16>, vector<128x128xbf16>, vector<16x128xf32> -> vector<16x128xf32>
    %15 = arith.addf %13, %14 : vector<16x128xf32>
    %16 = arith.mulf %15, %15 : vector<16x128xf32>
    %cst_15 = arith.constant dense<0.000000e+00> : vector<16xf32>
    %17 = vector.multi_reduction <add>, %16, %cst_15 [1] : vector<16x128xf32> to vector<16xf32>
    %18 = vector.shape_cast %17 : vector<16xf32> to vector<16x1xf32>
    %cst_16 = arith.constant 1.000000e-24 : f32
    %19 = vector.broadcast %cst_16 : f32 to vector<16x1xf32>
    %20 = arith.maximumf %18, %19 : vector<16x1xf32>
    %21 = math.rsqrt %20 : vector<16x1xf32>
    %22 = vector.broadcast %21 : vector<16x1xf32> to vector<16x128xf32>
    %23 = arith.mulf %15, %22 : vector<16x128xf32>
    %c0_17 = arith.constant 0 : index
    %c0_18 = arith.constant 0 : index
    %24 = vector.load %arg8[%c0_17, %c0_18] : memref<16x128xf32, #tpu.memory_space<vmem>>, vector<16x128xf32>
    tpu.vector_store %arg8[%c0_17, %c0_18], %23 {strides = array<i32>} : memref<16x128xf32, #tpu.memory_space<vmem>>, vector<16x128xf32>,
    return
  }
  func.func @transform_0(%arg0: i32) -> (i32, i32) {
    %c0_i32 = arith.constant 0 : i32
    %c0_i32_0 = arith.constant 0 : i32
    return %arg0, %c0_i32 : i32, i32
  }
  func.func @transform_1(%arg0: i32) -> (i32, i32) {
    %c0_i32 = arith.constant 0 : i32
    %c0_i32_0 = arith.constant 0 : i32
    return %arg0, %c0_i32 : i32, i32
  }
  func.func @transform_2(%arg0: i32) -> (i32, i32) {
    %c0_i32 = arith.constant 0 : i32
    %c0_i32_0 = arith.constant 0 : i32
    %c0_i32_1 = arith.constant 0 : i32
    return %c0_i32, %c0_i32_0 : i32, i32
  }
  func.func @transform_3(%arg0: i32) -> (i32, i32) {
    %c0_i32 = arith.constant 0 : i32
    %c0_i32_0 = arith.constant 0 : i32
    return %arg0, %c0_i32 : i32, i32
  }
  func.func @transform_4(%arg0: i32) -> (i32, i32) {
    %c0_i32 = arith.constant 0 : i32
    %c0_i32_0 = arith.constant 0 : i32
    %c0_i32_1 = arith.constant 0 : i32
    return %c0_i32, %c0_i32_0 : i32, i32
  }
  func.func @transform_5(%arg0: i32) -> (i32, i32) {
    %c0_i32 = arith.constant 0 : i32
    %c0_i32_0 = arith.constant 0 : i32
    %c0_i32_1 = arith.constant 0 : i32
    return %c0_i32, %c0_i32_0 : i32, i32
  }
  func.func @transform_6(%arg0: i32) -> (i32, i32) {
    %c0_i32 = arith.constant 0 : i32
    %c0_i32_0 = arith.constant 0 : i32
    %c0_i32_1 = arith.constant 0 : i32
    return %c0_i32, %c0_i32_0 : i32, i32
  }
  func.func @transform_7(%arg0: i32) -> (i32, i32) {
    %c0_i32 = arith.constant 0 : i32
    %c0_i32_0 = arith.constant 0 : i32
    return %arg0, %c0_i32 : i32, i32
  }
}

</mosaic_0001>

<bundles_post_ra>
// kernel: sage_forward.3
= control target key start
LH: loop header
LB: loop body
LE: loop exit
PB: predicated region body
PF: predicated region fallthrough
CT: control target
= control target key end

     0   :  { %v505_v1 = vmov 0.0   ;;  %vm506_vm0 = vmmov 0   ;;  %vm43_vm1 = vcmask 130048   ;;  %v507_v4 = vmov 0   ;;  %s632_s0 = inlined_call_operand.vmem [shape: bf16[16,16], index: 0, kind: input, shape index: {}]   ;;  %s633_s1 = inlined_call_operand.vmem [shape: f32[16,1], index: 1, kind: input, shape index: {}]   ;;  %s634_s2 = inlined_call_operand.vmem [shape: bf16[16,128], index: 2, kind: input, shape index: {}, may-alias: {2,3}]   ;;  %s635_s3 = inlined_call_operand.vmem [shape: bf16[16,128], index: 3, kind: input, shape index: {}, may-alias: {2,3}]   ;;  %s636_s4 = inlined_call_operand.vmem [shape: bf16[128,128], index: 4, kind: input, shape index: {}]   ;;  %s637_s5 = inlined_call_operand.vmem [shape: f32[1,128], index: 5, kind: input, shape index: {}]   ;;  %s638_s6 = inlined_call_operand.vmem [shape: bf16[128,128], index: 6, kind: input, shape index: {}]   ;;  %s639_s7 = inlined_call_operand.hbm [shape: f32[16,128], index: 7, kind: output, shape index: {}]  }
   0x1   :  { %v458_v0 = vld [vmem:[%s634_s2] sm:$0xff]   ;;  %401 = vmatprep.subr.bf16.mxu0 %v505_v1  ;;  %427 = vmatprep.subr.bf16.mxu1 %v505_v1  ;;  %v89_v5 = vld [vmem:[%s633_s1 + $0x8] sm:$0xff]  ;;  %v464_v10 = vld [vmem:[%s638_s6 + $0x10] sm:$0xff]  }
   0x2   :  { %v459_v2 = vld [vmem:[%s632_s0] sm:$0xff]   ;;  %402 = vmatpush3.bf16.msra.mxu0 %v458_v0  ;;  %403 = vmatprep.mubr.msk.bf16.mxu0 %vm506_vm0, %v505_v1  ;;  %v462_v8 = vld [vmem:[%s638_s6 + $0x8] sm:$0xff]   ;;  %v465_v11 = vld [vmem:[%s636_s4 + $0x10] sm:$0xff]  }
   0x3   :  { %v88_v3 = vld [vmem:[%s633_s1] sm:$0xff]  ;;  %457 = vset.pattern.permute.xlu0 %v507_v4  ;;  %407 = vmatprep.subr.bf16.mxu0 %v505_v1  ;;  %v463_v9 = vld [vmem:[%s636_s4 + $0x8] sm:$0xff]   ;;  %v466_v12 = vld [vmem:[%s638_s6 + $0x18] sm:$0xff]  }
   0x4   :  { %v460_v6 = vld [vmem:[%s638_s6] sm:$0xff]   ;;  %92 = vperm.xlu0 %457, %v88_v3   ;;  %443 = vmatprep.mubr.msk.bf16.mxu1 %vm506_vm0, %v505_v1  ;;  %v467_v13 = vld [vmem:[%s636_s4 + $0x18] sm:$0xff]  }
   0x5   :  { %v461_v7 = vld [vmem:[%s636_s4] sm:$0xff]   ;;  %404 = vmatmul.mubr.msk.bf16.vlgmr.msra.gmra.mrb[0].mxu0 %vm43_vm1, %v459_v2  ;;  %428 = vmatpush3.bf16.msra.mxu1 %v460_v6 }
   0x6   :  { %408 = vmatpush3.bf16.msra.mxu0 %v461_v7  ;;  %429 = vmatprep.subr.bf16.mxu1 %v505_v1  ;;  %v468_v14 = vld [vmem:[%s638_s6 + $0x20] sm:$0xff]  }
   0x7   :  { %409 = vmatprep.subr.bf16.mxu0 %v505_v1  ;;  %423 = vmatprep.mubr.msk.bf16.mxu0 %vm506_vm0, %v505_v1  ;;  %v469_v15 = vld [vmem:[%s636_s4 + $0x20] sm:$0xff]  }
   0x8   :  { %97 = vperm.xlu0 %457, %v89_v5  }
   0x9   :  { %430 = vmatpush3.bf16.msra.mxu1 %v462_v8 }
   0xa   :  { %410 = vmatpush3.bf16.msra.mxu0 %v463_v9  ;;  %431 = vmatprep.subr.bf16.mxu1 %v505_v1 }
   0xb   :  { %411 = vmatprep.subr.bf16.mxu0 %v505_v1 }
   0xd   :  { %432 = vmatpush3.bf16.msra.mxu1 %v464_v10 }
   0xe   :  { %412 = vmatpush3.bf16.msra.mxu0 %v465_v11  ;;  %433 = vmatprep.subr.bf16.mxu1 %v505_v1 }
   0xf   :  { %413 = vmatprep.subr.bf16.mxu0 %v505_v1 }
  0x11   :  { %434 = vmatpush3.bf16.msra.mxu1 %v466_v12 }
  0x12   :  { %414 = vmatpush3.bf16.msra.mxu0 %v467_v13  ;;  %435 = vmatprep.subr.bf16.mxu1 %v505_v1 }
  0x13   :  { %12 = vsyncpa [#allocation3], 0  ;;  %415 = vmatprep.subr.bf16.mxu0 %v505_v1  ;;  %v470_v16 = vld [vmem:[%s638_s6 + $0x28] sm:$0xff]   ;;  %v472_v18 = vld [vmem:[%s638_s6 + $0x30] sm:$0xff]  }
  0x14   :  { %v471_v17 = vld [vmem:[%s636_s4 + $0x28] sm:$0xff]   ;;  %v473_v19 = vld [vmem:[%s636_s4 + $0x30] sm:$0xff]   ;;  %v474_v20 = vld [vmem:[%s638_s6 + $0x38] sm:$0xff]  }
  0x15   :  { %436 = vmatpush3.bf16.msra.mxu1 %v468_v14  ;;  %v475_v21 = vld [vmem:[%s636_s4 + $0x38] sm:$0xff]   ;;  %v476_v22 = vld [vmem:[%s635_s3] sm:$0xff]   ;;  %s508_s3 = smov [#allocation2]  }
  0x16   :  { %416 = vmatpush3.bf16.msra.mxu0 %v469_v15  ;;  %437 = vmatprep.subr.bf16.mxu1 %v505_v1  ;;  %v363_v36 = vld [vmem:[%s637_s5] ss:$0 sm:$0xff]  ;;  %s349_s5 = sshll.u32 %s508_s3, 4  ;;  %s350_s5 = int_to_ptr.vmem [resolvable:$true] %s349_s5 }
  0x17   :  { %417 = vmatprep.subr.bf16.mxu0 %v505_v1  ;;  %s481_s14 = scalar_lea.vmem %s350_s5, 256  ;;  %p486_p1 = scmp.lt.s32.totalorder %s350_s5, %s350_s5 }
  0x18   :  { %p482_p0 = scmp.ne.s32.totalorder %s350_s5, %s481_s14  ;;  %p487_p2 = scmp.lt.s32.totalorder %s481_s14, %s481_s14 }
  0x19   :  { %438 = vmatpush3.bf16.msra.mxu1 %v470_v16 }
  0x1a   :  { %418 = vmatpush3.bf16.msra.mxu0 %v471_v17  ;;  %439 = vmatprep.subr.bf16.mxu1 %v505_v1  ;;  %p488_p3 = por %p487_p2, %p486_p1 }
  0x1b   :  { %419 = vmatprep.subr.bf16.mxu0 %v505_v1 }
  0x1c   :  { %p489_p4 = pnand %p488_p3, %p482_p0 }
  0x1d   :  { %440 = vmatpush3.bf16.msra.mxu1 %v472_v18 }
  0x1e   :  { %441 = vmatprep.subr.bf16.mxu1 %v505_v1  ;;  %420 = vmatpush3.bf16.msra.mxu0 %v473_v19 }
  0x1f   :  { %421 = vmatprep.subr.bf16.mxu0 %v505_v1 }
  0x21   :  { %442 = vmatpush3.bf16.msra.mxu1 %v474_v20 }
  0x22   :  { %422 = vmatpush3.bf16.msra.mxu0 %v475_v21 }
  0x24   :  { %444 = vmatmul.mubr.bf16.vlgmr.msra.gmra.mrb[0].mxu1 %v476_v22 }
  0x83   :  { %v93_v23 = vpop.permute.xlu0 %92 }
  0x87   :  { %v98_v26 = vpop.permute.xlu0 %97 }
  0xd8   :  { %v81_v24 = vpop.f32.mrb[0].mxu0 }
  0xd9   :  { %v405_v25 = vpop.f32.mrb[1].mxu0  ;;  %v100_v28 = vmul.f32 %v93_v23, %v81_v24 }
  0xda   :  { %v84_v27 = vpop.f32.mrb[2].mxu0 }
  0xdb   :  { %v101_v29 = vmul.f32 %v98_v26, %v84_v27  ;;  %v406_v30 = vpop.f32.mrb[3].mxu0 }
  0xdd   :  { %v102_v31 = vpack.c.bf16 %v101_v29, %v100_v28 }
  0xdf   :  { %424 = vmatmul.mubr.bf16.vlgmr.msra.gmra.mrb[4].mxu0 %v102_v31 }
  0xf7   :  { %v321_v32 = vpop.f32.mrb[0].mxu1 }
  0xf8   :  { %v445_v33 = vpop.f32.mrb[1].mxu1 }
  0xf9   :  { %v324_v34 = vpop.f32.mrb[2].mxu1 }
  0xfa   :  { %v446_v35 = vpop.f32.mrb[3].mxu1 }
 0x1b2   :  { %v226_v37 = vpop.f32.mrb[4].mxu0 }
 0x1b3   :  { %v227_v38 = vadd.f32 %v363_v36, %v226_v37  ;;  %v425_v39 = vpop.f32.mrb[5].mxu0 }
 0x1b4   :  { %v229_v40 = vpop.f32.mrb[6].mxu0 }
 0x1b5   :  { %v230_v41 = vadd.f32 %v363_v36, %v229_v40  ;;  %v426_v42 = vpop.f32.mrb[7].mxu0  ;;  %v328_v43 = vadd.f32 %v321_v32, %v227_v38 }
 0x1b7   :  { %v329_v44 = vadd.f32 %v324_v34, %v230_v41  ;;  %v330_v45 = vmul.f32 %v328_v43, %v328_v43 }
 0x1b9   :  { %332 = vadd.xlane.f32.xlu1 %v330_v45  ;;  %v331_v46 = vmul.f32 %v329_v44, %v329_v44 }
 0x1bd   :  { %334 = vadd.xlane.f32.xlu1 %v331_v46 }
 0x246   :  { %v333_v47 = vpop.xlane.xlu1 %332 }
 0x247   :  { %v336_v48 = vmax.f32 %v333_v47, 1e-24 }
 0x249   :  { %477 = vrsqrt.f32 %v336_v48 }
 0x24a   :  { %v335_v49 = vpop.xlane.xlu1 %334 }
 0x24b   :  { %v337_v50 = vmax.f32 %v335_v49, 1e-24 }
 0x24d   :  { %479 = vrsqrt.f32 %v337_v50 }
 0x253   :  { %v478_v51 = vpop.eup %477 }
 0x254   :  { %v340_v52 = vmul.f32 %v478_v51, %v328_v43 }
 0x256   :  { %342 = vst [vmem:[#allocation2] sm:$0xff] %v340_v52 }
 0x257   :  { %v480_v53 = vpop.eup %479 }
 0x258   :  { %v341_v54 = vmul.f32 %v480_v53, %v329_v44 }
 0x25a   :  { %343 = vst [vmem:[#allocation2 + $0x8] sm:$0xff] %v341_v54 }
 0x25b   :  { %492 = shalt.err (!%p489_p4)
}
 0x25c   :  { %s493_s17 = scalar_lea.hbm %s639_s7, 256 }
 0x25d   :  { %p494_p5 = scmp.ne.s32.totalorder %s639_s7, %s493_s17  ;;  %p497_p6 = scmp.lt.u32.totalorder %s493_s17, %s639_s7 }
 0x25f   :  { %p499_p7 = pnand %p497_p6, %p494_p5 }
 0x261   :  { %502 = shalt.err (!%p499_p7)
}
 0x262   :  { %s509_s22 = smov 128   ;;  %s510_s23 = smov 8  }
 0x263   :  { %355 = dma.vmem_to_hbm [thread:$0]  %s350_s5, 256, %s639_s7, [#allocation3], %s509_s22, %s509_s22, %s510_s23  }
 0x264   :  { %503 = dma.done.wait [#allocation3], 256  }
 0x265   :  { %504 = vsyncadd [#allocation3], 4294967040 }
 0x266   :  { %359 = vsyncpa [#allocation3], 1 }

// kernel: sage_forward.2
= control target key start
LH: loop header
LB: loop body
LE: loop exit
PB: predicated region body
PF: predicated region fallthrough
CT: control target
= control target key end

     0   :  { %v467_v0 = vmov 0.0   ;;  %vm468_vm0 = vmmov 0   ;;  %v469_v3 = vmov 0   ;;  %vm42_vm1 = vcmask 130048   ;;  %s585_s2 = inlined_call_operand.vmem [shape: bf16[16,128], index: 2, kind: input, shape index: {}, may-alias: {2,3}]   ;;  %s586_s0 = inlined_call_operand.vmem [shape: bf16[16,16], index: 0, kind: input, shape index: {}]   ;;  %s587_s1 = inlined_call_operand.vmem [shape: f32[16,1], index: 1, kind: input, shape index: {}]   ;;  %s588_s6 = inlined_call_operand.vmem [shape: bf16[128,128], index: 6, kind: input, shape index: {}]   ;;  %s589_s4 = inlined_call_operand.vmem [shape: bf16[128,128], index: 4, kind: input, shape index: {}]   ;;  %s590_s3 = inlined_call_operand.vmem [shape: bf16[16,128], index: 3, kind: input, shape index: {}, may-alias: {2,3}]   ;;  %s591_s5 = inlined_call_operand.vmem [shape: f32[1,128], index: 5, kind: input, shape index: {}]   ;;  %s592_s7 = inlined_call_operand.vmem [shape: f32[16,128], index: 7, kind: output, shape index: {}]  }
   0x1   :  { %390 = vmatprep.subr.bf16.mxu0 %v467_v0  ;;  %v444_v1 = vld [vmem:[%s585_s2] sm:$0xff]   ;;  %392 = vmatprep.mubr.msk.bf16.mxu0 %vm468_vm0, %v467_v0  ;;  %v88_v5 = vld [vmem:[%s587_s1 + $0x8] sm:$0xff]  ;;  %v450_v10 = vld [vmem:[%s588_s6 + $0x10] sm:$0xff]  }
   0x2   :  { %v445_v2 = vld [vmem:[%s586_s0] sm:$0xff]   ;;  %443 = vset.pattern.permute.xlu0 %v469_v3  ;;  %416 = vmatprep.subr.bf16.mxu1 %v467_v0  ;;  %v448_v8 = vld [vmem:[%s588_s6 + $0x8] sm:$0xff]   ;;  %v451_v11 = vld [vmem:[%s589_s4 + $0x10] sm:$0xff]  }
   0x3   :  { %391 = vmatpush3.bf16.msra.mxu0 %v444_v1  ;;  %v87_v4 = vld [vmem:[%s587_s1] sm:$0xff]  ;;  %432 = vmatprep.mubr.msk.bf16.mxu1 %vm468_vm0, %v467_v0  ;;  %v449_v9 = vld [vmem:[%s589_s4 + $0x8] sm:$0xff]   ;;  %v452_v12 = vld [vmem:[%s588_s6 + $0x18] sm:$0xff]  }
   0x4   :  { %91 = vperm.xlu0 %443, %v87_v4   ;;  %396 = vmatprep.subr.bf16.mxu0 %v467_v0  ;;  %v446_v6 = vld [vmem:[%s588_s6] sm:$0xff]   ;;  %v453_v13 = vld [vmem:[%s589_s4 + $0x18] sm:$0xff]   ;;  %v456_v16 = vld [vmem:[%s588_s6 + $0x28] sm:$0xff]  }
   0x5   :  { %v447_v7 = vld [vmem:[%s589_s4] sm:$0xff]   ;;  %417 = vmatpush3.bf16.msra.mxu1 %v446_v6  ;;  %v457_v17 = vld [vmem:[%s589_s4 + $0x28] sm:$0xff]   ;;  %v458_v18 = vld [vmem:[%s588_s6 + $0x30] sm:$0xff]  }
   0x6   :  { %393 = vmatmul.mubr.msk.bf16.vlgmr.msra.gmra.mrb[0].mxu0 %vm42_vm1, %v445_v2  ;;  %418 = vmatprep.subr.bf16.mxu1 %v467_v0  ;;  %v454_v14 = vld [vmem:[%s588_s6 + $0x20] sm:$0xff]   ;;  %v459_v19 = vld [vmem:[%s589_s4 + $0x30] sm:$0xff]   ;;  %v460_v20 = vld [vmem:[%s588_s6 + $0x38] sm:$0xff]  }
   0x7   :  { %397 = vmatpush3.bf16.msra.mxu0 %v447_v7  ;;  %412 = vmatprep.mubr.msk.bf16.mxu0 %vm468_vm0, %v467_v0  ;;  %v455_v15 = vld [vmem:[%s589_s4 + $0x20] sm:$0xff]   ;;  %v461_v21 = vld [vmem:[%s589_s4 + $0x38] sm:$0xff]  }
   0x8   :  { %96 = vperm.xlu0 %443, %v88_v5   ;;  %398 = vmatprep.subr.bf16.mxu0 %v467_v0  ;;  %v462_v22 = vld [vmem:[%s590_s3] sm:$0xff]  }
   0x9   :  { %419 = vmatpush3.bf16.msra.mxu1 %v448_v8  ;;  %v352_v36 = vld [vmem:[%s591_s5] ss:$0 sm:$0xff] }
   0xa   :  { %420 = vmatprep.subr.bf16.mxu1 %v467_v0 }
   0xb   :  { %399 = vmatpush3.bf16.msra.mxu0 %v449_v9 }
   0xc   :  { %400 = vmatprep.subr.bf16.mxu0 %v467_v0 }
   0xd   :  { %421 = vmatpush3.bf16.msra.mxu1 %v450_v10 }
   0xe   :  { %422 = vmatprep.subr.bf16.mxu1 %v467_v0 }
   0xf   :  { %401 = vmatpush3.bf16.msra.mxu0 %v451_v11 }
  0x10   :  { %402 = vmatprep.subr.bf16.mxu0 %v467_v0 }
  0x11   :  { %423 = vmatpush3.bf16.msra.mxu1 %v452_v12 }
  0x12   :  { %424 = vmatprep.subr.bf16.mxu1 %v467_v0 }
  0x13   :  { %403 = vmatpush3.bf16.msra.mxu0 %v453_v13 }
  0x14   :  { %404 = vmatprep.subr.bf16.mxu0 %v467_v0 }
  0x15   :  { %425 = vmatpush3.bf16.msra.mxu1 %v454_v14 }
  0x16   :  { %426 = vmatprep.subr.bf16.mxu1 %v467_v0 }
  0x17   :  { %405 = vmatpush3.bf16.msra.mxu0 %v455_v15 }
  0x18   :  { %406 = vmatprep.subr.bf16.mxu0 %v467_v0 }
  0x19   :  { %427 = vmatpush3.bf16.msra.mxu1 %v456_v16 }
  0x1a   :  { %428 = vmatprep.subr.bf16.mxu1 %v467_v0 }
  0x1b   :  { %407 = vmatpush3.bf16.msra.mxu0 %v457_v17 }
  0x1c   :  { %408 = vmatprep.subr.bf16.mxu0 %v467_v0 }
  0x1d   :  { %429 = vmatpush3.bf16.msra.mxu1 %v458_v18 }
  0x1e   :  { %430 = vmatprep.subr.bf16.mxu1 %v467_v0 }
  0x1f   :  { %409 = vmatpush3.bf16.msra.mxu0 %v459_v19 }
  0x20   :  { %410 = vmatprep.subr.bf16.mxu0 %v467_v0 }
  0x21   :  { %431 = vmatpush3.bf16.msra.mxu1 %v460_v20 }
  0x23   :  { %411 = vmatpush3.bf16.msra.mxu0 %v461_v21 }
  0x24   :  { %433 = vmatmul.mubr.bf16.vlgmr.msra.gmra.mrb[0].mxu1 %v462_v22 }
  0x83   :  { %v92_v23 = vpop.permute.xlu0 %91 }
  0x87   :  { %v97_v26 = vpop.permute.xlu0 %96 }
  0xd9   :  { %v80_v24 = vpop.f32.mrb[0].mxu0 }
  0xda   :  { %v394_v25 = vpop.f32.mrb[1].mxu0  ;;  %v99_v28 = vmul.f32 %v92_v23, %v80_v24 }
  0xdb   :  { %v83_v27 = vpop.f32.mrb[2].mxu0 }
  0xdc   :  { %v100_v29 = vmul.f32 %v97_v26, %v83_v27  ;;  %v395_v30 = vpop.f32.mrb[3].mxu0 }
  0xde   :  { %v101_v31 = vpack.c.bf16 %v100_v29, %v99_v28 }
  0xe0   :  { %413 = vmatmul.mubr.bf16.vlgmr.msra.gmra.mrb[4].mxu0 %v101_v31 }
  0xf7   :  { %v320_v32 = vpop.f32.mrb[0].mxu1 }
  0xf8   :  { %v434_v33 = vpop.f32.mrb[1].mxu1 }
  0xf9   :  { %v323_v34 = vpop.f32.mrb[2].mxu1 }
  0xfa   :  { %v435_v35 = vpop.f32.mrb[3].mxu1 }
 0x1b3   :  { %v225_v37 = vpop.f32.mrb[4].mxu0 }
 0x1b4   :  { %v226_v38 = vadd.f32 %v352_v36, %v225_v37  ;;  %v414_v39 = vpop.f32.mrb[5].mxu0 }
 0x1b5   :  { %v228_v40 = vpop.f32.mrb[6].mxu0 }
 0x1b6   :  { %v229_v41 = vadd.f32 %v352_v36, %v228_v40  ;;  %v415_v42 = vpop.f32.mrb[7].mxu0  ;;  %v327_v43 = vadd.f32 %v320_v32, %v226_v38 }
 0x1b8   :  { %v328_v44 = vadd.f32 %v323_v34, %v229_v41  ;;  %v329_v45 = vmul.f32 %v327_v43, %v327_v43 }
 0x1ba   :  { %331 = vadd.xlane.f32.xlu1 %v329_v45  ;;  %v330_v46 = vmul.f32 %v328_v44, %v328_v44 }
 0x1be   :  { %333 = vadd.xlane.f32.xlu1 %v330_v46 }
 0x247   :  { %v332_v47 = vpop.xlane.xlu1 %331 }
 0x248   :  { %v335_v48 = vmax.f32 %v332_v47, 1e-24 }
 0x24a   :  { %463 = vrsqrt.f32 %v335_v48 }
 0x24b   :  { %v334_v49 = vpop.xlane.xlu1 %333 }
 0x24c   :  { %v336_v50 = vmax.f32 %v334_v49, 1e-24 }
 0x24e   :  { %465 = vrsqrt.f32 %v336_v50 }
 0x254   :  { %v464_v51 = vpop.eup %463 }
 0x255   :  { %v339_v52 = vmul.f32 %v464_v51, %v327_v43 }
 0x257   :  { %v341_v53 = vmax.f32 %v339_v52, 0.0 }
 0x258   :  { %v466_v54 = vpop.eup %465 }
 0x259   :  { %343 = vst [vmem:[%s592_s7] sm:$0xff] %v341_v53  ;;  %v340_v55 = vmul.f32 %v466_v54, %v328_v44 }
 0x25b   :  { %v342_v56 = vmax.f32 %v340_v55, 0.0 }
 0x25d   :  { %344 = vst [vmem:[%s592_s7 + $0x8] sm:$0xff] %v342_v56 }

</bundles_post_ra>
